<compile_context>
chip_gen: v5e
topology: v5e:2x2
jax: 0.10.0
libtpu: 0.0.40
codegen_flags: <defaults>
</compile_context>

<pallas_src>
import functools

import jax
import jax.numpy as jnp
from jax.experimental import pallas as pl
from jax.experimental.pallas import tpu as pltpu


def _round_up(x, m):
    return ((x + m - 1) // m) * m


def _reward_head_kernel(h_ref, w_ref, b_ref, o_ref):
    """h_ref: (TB, H) bf16, w_ref: (1, H) bf16, b_ref: (1, 1) f32 SMEM,
    o_ref: (1, TB) f32 (batch on the lane axis)."""
    h = h_ref[...].astype(jnp.float32)          # upcast before multiply (v5e-safe)
    w = w_ref[...].astype(jnp.float32)          # (1, H)
    r = jnp.sum(h * w, axis=-1)                 # (TB,) f32 accumulation (VPU + XLU)
    bias = b_ref[0, 0]                          # SMEM scalar
    o_ref[...] = (r + bias).reshape(1, -1)      # lane-dense store


@functools.partial(jax.jit, static_argnames=("tb",))
def reward_head(h_last, w_out, b_out, *, tb=512):
    """Linear(H, 1) on last-token hidden states via Pallas.

    h_last: (B, H) float (any dtype; carried as bf16 into the kernel)
    w_out:  (1, H) float (PyTorch nn.Linear weight layout)
    b_out:  (1, 1) float32
    returns (B, 1) float32
    """
    B, H = h_last.shape

    # Tile over batch. TB is a multiple of 8; pad B up to a multiple of TB.
    tb = min(tb, _round_up(B, 8))
    b_pad = _round_up(B, tb)
    num_tiles = pl.cdiv(b_pad, tb)

    h_bf16 = h_last.astype(jnp.bfloat16)
    if b_pad != B:
        h_bf16 = jnp.pad(h_bf16, ((0, b_pad - B), (0, 0)))
    w_bf16 = w_out.astype(jnp.bfloat16)
    b_f32 = b_out.astype(jnp.float32)

    out = pl.pallas_call(
        _reward_head_kernel,
        out_shape=jax.ShapeDtypeStruct((1, b_pad), jnp.float32),
        grid=(num_tiles,),
        in_specs=[
            pl.BlockSpec((tb, H), lambda i: (i, 0)),                # hidden tile
            pl.BlockSpec((1, H), lambda i: (0, 0)),                 # weight (resident)
            pl.BlockSpec((1, 1), lambda i: (0, 0),
                         memory_space=pltpu.MemorySpace.SMEM),      # bias scalar
        ],
        out_specs=pl.BlockSpec((1, tb), lambda i: (0, i)),          # lane-dense output
        compiler_params=pltpu.CompilerParams(
            dimension_semantics=("parallel",),                      # megacore on v7x
        ),
    )(h_bf16, w_bf16, b_f32)

    # Back to the PyTorch (B, 1) layout; drop batch padding.
    return out[0, :B].reshape(B, 1)


def synthetic_base_model(input_ids, attn_mask, embed_tbl, w_dense):
    """Deterministic stand-in for the pretrained LM (plain-JAX glue).

    Returns hidden states of shape (B, S, H).
    """
    x = jnp.take(embed_tbl, input_ids, axis=0)                 # (B, S, H)
    x = x * attn_mask[..., None].astype(x.dtype)               # mask feeds backbone only
    return jnp.tanh(x @ w_dense)                               # (B, S, H)


def reward_model_forward(input_ids, attn_mask, params):
    hidden = synthetic_base_model(
        input_ids, attn_mask, params["embed"], params["w_dense"]
    )
    # hidden_states[-1][:, -1, :] — last-token select done here (cheap XLA
    # slice) so the Pallas kernel never moves the S axis through HBM->VMEM.
    # NOTE: index S-1 matches PyTorch semantics; if sequences are right-padded
    # this selects a pad-token hidden state on both sides (attn_mask is only
    # consumed by the backbone), same as the reference module.
    h_last = hidden[:, -1, :]                                  # (B, H)
    return reward_head(h_last, params["w_out"], params["b_out"])


if __name__ == "__main__":
    B, S, H, V = 2, 8, 128, 64  # batch, seq, hidden_dim, vocab (small synthetic sizes)

    key = jax.random.PRNGKey(0)
    k_ids, k_emb, k_dense, k_wout = jax.random.split(key, 4)

    input_ids = jax.random.randint(k_ids, (B, S), 0, V, dtype=jnp.int32)
    attn_mask = jnp.ones((B, S), dtype=jnp.int32)

    params = {
        "embed":   0.02 * jax.random.normal(k_emb,   (V, H), jnp.float32),
        "w_dense": 0.02 * jax.random.normal(k_dense, (H, H), jnp.float32),
        # nn.Linear(hidden_dim, 1): weight (1, H), bias zeros (as in the commented init)
        "w_out":   0.02 * jax.random.normal(k_wout,  (1, H), jnp.float32),
        "b_out":   jnp.zeros((1, 1), jnp.float32),
    }

    reward = reward_model_forward(input_ids, attn_mask, params)
    reward = jax.block_until_ready(reward)

    # Pure-JAX reference for the part implemented in Pallas (same bf16 carrier
    # quantization as the kernel, f32 accumulation).
    hidden_ref = synthetic_base_model(
        input_ids, attn_mask, params["embed"], params["w_dense"]
    )
    h_ref = hidden_ref[:, -1, :].astype(jnp.bfloat16).astype(jnp.float32)
    w_ref = params["w_out"].astype(jnp.bfloat16).astype(jnp.float32)
    reward_ref = h_ref @ w_ref.T + params["b_out"]

    assert reward.shape == (B, 1), reward.shape
    assert jnp.allclose(reward, reward_ref, atol=1e-5, rtol=1e-4), (
        reward, reward_ref)
    print("KERNEL_OK")
</pallas_src>

<mosaic_0001>
module attributes {stable_mosaic.version = 11 : i64} {
  func.func @_reward_head_kernel(%arg0: i32, %arg1: memref<8x128xbf16, #tpu.memory_space<vmem>>, %arg2: memref<1x128xbf16, #tpu.memory_space<vmem>>, %arg3: memref<1x1xf32, #tpu.memory_space<smem>>, %arg4: memref<1x8xf32, #tpu.memory_space<vmem>>) attributes {dimension_semantics = [#tpu.dimension_semantics<parallel>], iteration_bounds = array<i64: 1>, scalar_prefetch = 0 : i64, scratch_operands = 0 : i64, tpu.core_type = #tpu.core_type<tc>, window_params = [{transform_indices = @transform_0, window_bounds = array<i64: 8, 128>}, {pipeline_mode = #tpu.pipeline_mode<synchronous>, transform_indices = @transform_1, window_bounds = array<i64: 1, 128>}, {transform_indices = @transform_2, window_bounds = array<i64: 1, 1>}, {transform_indices = @transform_3, window_bounds = array<i64: 1, 8>}]} {
    %c0 = arith.constant 0 : index
    %c0_0 = arith.constant 0 : index
    %0 = vector.load %arg1[%c0, %c0_0] : memref<8x128xbf16, #tpu.memory_space<vmem>>, vector<8x128xbf16>
    %1 = arith.extf %0 : vector<8x128xbf16> to vector<8x128xf32>
    %c0_1 = arith.constant 0 : index
    %c0_2 = arith.constant 0 : index
    %2 = vector.load %arg2[%c0_1, %c0_2] : memref<1x128xbf16, #tpu.memory_space<vmem>>, vector<1x128xbf16>
    %3 = arith.extf %2 : vector<1x128xbf16> to vector<1x128xf32>
    %4 = vector.broadcast %3 : vector<1x128xf32> to vector<8x128xf32>
    %5 = arith.mulf %1, %4 : vector<8x128xf32>
    %cst = arith.constant dense<0.000000e+00> : vector<8xf32>
    %6 = vector.multi_reduction <add>, %5, %cst [1] : vector<8x128xf32> to vector<8xf32>
    %c0_3 = arith.constant 0 : index
    %c0_4 = arith.constant 0 : index
    %7 = memref.load %arg3[%c0_3, %c0_4] : memref<1x1xf32, #tpu.memory_space<smem>>
    %8 = vector.broadcast %7 : f32 to vector<8xf32>
    %9 = arith.addf %6, %8 : vector<8xf32>
    %10 = vector.shape_cast %9 : vector<8xf32> to vector<1x8xf32>
    %c0_5 = arith.constant 0 : index
    %c0_6 = arith.constant 0 : index
    %11 = vector.load %arg4[%c0_5, %c0_6] : memref<1x8xf32, #tpu.memory_space<vmem>>, vector<1x8xf32>
    tpu.vector_store %arg4[%c0_5, %c0_6], %10 {strides = array<i32>} : memref<1x8xf32, #tpu.memory_space<vmem>>, vector<1x8xf32>,
    return
  }
  func.func @transform_0(%arg0: i32) -> (i32, i32) {
    %c0_i32 = arith.constant 0 : i32
    %c0_i32_0 = arith.constant 0 : i32
    return %arg0, %c0_i32 : i32, i32
  }
  func.func @transform_1(%arg0: i32) -> (i32, i32) {
    %c0_i32 = arith.constant 0 : i32
    %c0_i32_0 = arith.constant 0 : i32
    %c0_i32_1 = arith.constant 0 : i32
    return %c0_i32, %c0_i32_0 : i32, i32
  }
  func.func @transform_2(%arg0: i32) -> (i32, i32) {
    %c0_i32 = arith.constant 0 : i32
    %c0_i32_0 = arith.constant 0 : i32
    %c0_i32_1 = arith.constant 0 : i32
    return %c0_i32, %c0_i32_0 : i32, i32
  }
  func.func @transform_3(%arg0: i32) -> (i32, i32) {
    %c0_i32 = arith.constant 0 : i32
    %c0_i32_0 = arith.constant 0 : i32
    return %c0_i32, %arg0 : i32, i32
  }
}

</mosaic_0001>

<bundles_post_ra>
// kernel: reward_head.1
= control target key start
LH: loop header
LB: loop body
LE: loop exit
PB: predicated region body
PF: predicated region fallthrough
CT: control target
= control target key end

     0   :  { %v27_v6 = vlaneseq  ;;  %vm31_vm0 = vcmask 57344   ;;  %s69_s0 = inlined_call_operand.vmem [shape: bf16[8,128], index: 0, kind: input, shape index: {}]   ;;  %s70_s1 = inlined_call_operand.vmem [shape: bf16[1,128], index: 1, kind: input, shape index: {}]   ;;  %s71_s2 = inlined_call_operand.<no memory space> [shape: f32[1,1], index: 2, kind: input, shape index: {}]   ;;  %s72_s3 = inlined_call_operand.vmem [shape: f32[1,8], index: 3, kind: output, shape index: {}]  }
   0x1   :  { %v15_v0 = vld [vmem:[%s69_s0] sm:$0xf]  ;;  %v24_v7 = vstv %s71_s2 }
   0x2   :  { %v17_v1 = vld [vmem:[%s70_s1] sm:$0x1]  ;;  %v16_v2 = vunpack.c.l.bf16 %v15_v0  ;;  %v28_v8 = vand.u32 127, %v27_v6 }
   0x3   :  { %v18_v3 = vunpack.c.l.bf16 %v17_v1 }
   0x5   :  { %v19_v4 = vperm.slane %v18_v3, 0 }
   0x7   :  { %v20_v5 = vmul.f32 %v19_v4, %v16_v2 }
   0x9   :  { %21 = vadd.xlane.f32.xlu0 %v20_v5 }
  0x7c   :  { %v22_v9 = vpop.xlane.xlu0 %21 }
  0x7d   :  { %v25_v10 = vadd.f32 %v24_v7, %v22_v9 }
  0x7f   :  { %v29_v11 = vperm.slane %v25_v10, %v28_v8 }
  0x81   :  { %32 = vst.msk [vmem:[%s72_s3] sm:$0x1] %vm31_vm0, %v29_v11 }

</bundles_post_ra>
